<compile_context>
chip_gen: v6e
topology: v6e:2x2x1
jax: 0.10.0
libtpu: 0.0.40
codegen_flags: <defaults>
</compile_context>

<pallas_src>
import functools

import jax
import jax.numpy as jnp
from jax.experimental import pallas as pl
from jax.experimental.pallas import tpu as pltpu

DROPOUT = 0.2  # matches the (module-level) DROPOUT constant in gpt.py


def _round_up(a, b):
    return ((a + b - 1) // b) * b


def _cdiv(a, b):
    return (a + b - 1) // b


def _pad2d(a, rows, cols):
    pr, pc = rows - a.shape[0], cols - a.shape[1]
    if pr == 0 and pc == 0:
        return a
    return jnp.pad(a, ((0, pr), (0, pc)))


# ---------------------------------------------------------------------------
# Kernel
# ---------------------------------------------------------------------------
def _ffn_kernel(*refs, apply_mask):
    # refs: x (tm, ne), w1 (ne, th), b1 (1, th), w2 (th, ne), b2 (1, ne),
    #       [mask (tm, ne) f32,] out (tm, ne), acc (tm, ne) f32 scratch
    if apply_mask:
        x_ref, w1_ref, b1_ref, w2_ref, b2_ref, m_ref, o_ref, acc_ref = refs
    else:
        x_ref, w1_ref, b1_ref, w2_ref, b2_ref, o_ref, acc_ref = refs
        m_ref = None

    j = pl.program_id(1)

    @pl.when(j == 0)
    def _():
        # Fold the second bias into the accumulator init (saves an epilogue add).
        acc_ref[...] = jnp.broadcast_to(
            b2_ref[...].astype(jnp.float32), acc_ref.shape)

    # First linear (native-dtype operands, f32 accumulate) + bias + ReLU.
    h = jnp.dot(x_ref[...], w1_ref[...], preferred_element_type=jnp.float32)
    h = jnp.maximum(h + b1_ref[...].astype(jnp.float32), 0.0)

    # Second linear: accumulate this hidden chunk's contribution in f32.
    acc_ref[...] += jnp.dot(h.astype(w2_ref.dtype), w2_ref[...],
                            preferred_element_type=jnp.float32)

    @pl.when(j == pl.num_programs(1) - 1)
    def _():
        y = acc_ref[...]
        if apply_mask:
            # Inverted dropout: mask already carries the 1/(1-p) scale.
            y = y * m_ref[...]
        o_ref[...] = y.astype(o_ref.dtype)


# ---------------------------------------------------------------------------
# Tiling / VMEM budgeting
# ---------------------------------------------------------------------------
def _vmem_budget_bytes():
    """Generation-aware usable VMEM (~3/4 of physical); conservative fallback."""
    try:
        cap = int(pltpu.get_tpu_info().vmem_capacity_bytes)
    except Exception:
        cap = 64 << 20          # v7x physical size (most restrictive)
    return max(32 << 20, (cap * 3) // 4)


def _vmem_need(tm, th, ne_p, itemsize, wbuf, with_mask):
    n = 2 * tm * ne_p * itemsize            # x tiles (double-buffered)
    n += 2 * tm * ne_p * itemsize           # out tiles
    n += tm * ne_p * 4                      # f32 accumulator scratch
    if with_mask:
        n += 2 * tm * ne_p * 4              # dropout mask tiles (f32)
    n += wbuf * ne_p * th * itemsize        # w1 tiles
    n += wbuf * th * ne_p * itemsize        # w2 tiles
    n += wbuf * 8 * th * itemsize           # b1 (sublane-padded)
    n += 2 * 8 * ne_p * itemsize            # b2
    return n


def _select_tiles(M8, ne_p, hidden, itemsize, tm_req, budget, with_mask):
    """Returns (tm, th, hd_p, weight_buffer_count)."""
    hd_full = _round_up(hidden, 128)

    tm_cands = []
    t = max(8, min(_round_up(tm_req, 8), M8))
    while True:
        tm_cands.append(t)
        if t <= 8:
            break
        t = max(8, _round_up(t // 2, 8))

    # 1) Weight-resident path: full hidden dim in one step (w1/w2 never re-DMA'd).
    for tm in tm_cands:
        if _vmem_need(tm, hd_full, ne_p, itemsize, 2, with_mask) <= budget:
            return tm, hd_full, hd_full, 2

    # 2) K-tile the hidden dim; prefer the largest row tile, then the largest th.
    for tm in tm_cands:
        th = hd_full
        while th > 128:
            th = max(128, _round_up(th // 2, 128))
            if _vmem_need(tm, th, ne_p, itemsize, 2, with_mask) <= budget:
                wbuf = 3 if _vmem_need(tm, th, ne_p, itemsize, 3,
                                       with_mask) <= budget else 2
                return tm, th, _round_up(hidden, th), wbuf

    # 3) Fallback: smallest legal tiles.
    return 8, 128, _round_up(hidden, 128), 2


# ---------------------------------------------------------------------------
# Wrapper
# ---------------------------------------------------------------------------
def feed_forward(x, w1, b1, w2, b2, *, dropout_rate=DROPOUT, training=False,
                 seed=0, tm=512, mxu_dtype=None):
    """x: (B, T, n_embed) or (M, n_embed).  Returns same shape/dtype as x."""
    orig_shape = x.shape
    out_dtype = x.dtype
    n_embed = orig_shape[-1]
    x2d = x.reshape(-1, n_embed)
    M = x2d.shape[0]
    hidden = w1.shape[1]

    if mxu_dtype is not None:           # e.g. jnp.bfloat16 for v6e/v7x MXU rate
        x2d = x2d.astype(mxu_dtype)
        w1 = w1.astype(mxu_dtype)
        w2 = w2.astype(mxu_dtype)

    itemsize = jnp.dtype(x2d.dtype).itemsize
    use_mask = bool(training) and float(dropout_rate) > 0.0

    # ---- tile selection ----------------------------------------------------
    ne_p = _round_up(n_embed, 128)                 # lane-dense last dim
    M8 = _round_up(M, 8)
    budget = _vmem_budget_bytes()
    tm_sel, th, hd_p, wbuf = _select_tiles(M8, ne_p, hidden, itemsize, tm,
                                           budget, use_mask)

    # Row tiles: near-equal sizes (minimal padding); keep >=2 tiles for large M
    # so the "parallel" axis can be sharded across v7x's two TensorCores.
    n_i = max(1, _cdiv(M8, tm_sel))
    if n_i == 1 and M8 >= 512:
        n_i = 2
    tm_eff = _round_up(_cdiv(M8, n_i), 8)
    M_p = tm_eff * n_i
    n_j = hd_p // th

    # ---- zero-pad operands (skipped when already aligned) ------------------
    x_p = _pad2d(x2d, M_p, ne_p)
    w1_p = _pad2d(w1, ne_p, hd_p)
    b1_p = _pad2d(b1.reshape(1, -1), 1, hd_p)
    w2_p = _pad2d(w2, hd_p, ne_p)
    b2_p = _pad2d(b2.reshape(1, -1), 1, ne_p)
    inputs = [x_p, w1_p, b1_p, w2_p, b2_p]

    # Weight BlockSpecs: resident (constant index) when n_j == 1; deeper
    # buffering for the big every-step-changing weight DMAs when K-tiled.
    if n_j > 1 and wbuf != 2:
        w1_spec = pl.BlockSpec((ne_p, th), lambda i, j: (0, j),
                               pipeline_mode=pl.Buffered(wbuf))
        w2_spec = pl.BlockSpec((th, ne_p), lambda i, j: (j, 0),
                               pipeline_mode=pl.Buffered(wbuf))
    else:
        w1_spec = pl.BlockSpec((ne_p, th), lambda i, j: (0, j))
        w2_spec = pl.BlockSpec((th, ne_p), lambda i, j: (j, 0))

    in_specs = [
        pl.BlockSpec((tm_eff, ne_p), lambda i, j: (i, 0)),   # x
        w1_spec,                                             # w1
        pl.BlockSpec((1, th), lambda i, j: (0, j)),          # b1
        w2_spec,                                             # w2
        pl.BlockSpec((1, ne_p), lambda i, j: (0, 0)),        # b2
    ]

    if use_mask:
        # TODO(synk): dropout mask uses jax.random, not torch's RNG stream.
        keep = jax.random.bernoulli(jax.random.PRNGKey(seed),
                                    1.0 - float(dropout_rate), (M, n_embed))
        mask = keep.astype(jnp.float32) * (1.0 / (1.0 - float(dropout_rate)))
        inputs.append(_pad2d(mask, M_p, ne_p))
        in_specs.append(pl.BlockSpec((tm_eff, ne_p), lambda i, j: (i, 0)))

    # ---- VMEM limit & advisory cost ----------------------------------------
    need = _vmem_need(tm_eff, th, ne_p, itemsize, wbuf, use_mask)
    if need <= budget:
        vmem_limit = int(max(min(need + (8 << 20), budget), 32 << 20))
    else:                               # fallback tiles; best effort
        vmem_limit = int(need + (4 << 20))

    cost = pl.CostEstimate(
        flops=4 * M_p * ne_p * hd_p,    # 2 matmuls x 2 flops/MAC
        transcendentals=0,
        bytes_accessed=int(sum(a.size * a.dtype.itemsize for a in inputs)
                           + M_p * ne_p * jnp.dtype(out_dtype).itemsize))

    kernel = functools.partial(_ffn_kernel, apply_mask=use_mask)

    out = pl.pallas_call(
        kernel,
        out_shape=jax.ShapeDtypeStruct((M_p, ne_p), out_dtype),
        grid_spec=pltpu.PrefetchScalarGridSpec(
            num_scalar_prefetch=0,
            grid=(n_i, n_j),
            in_specs=in_specs,
            out_specs=pl.BlockSpec((tm_eff, ne_p), lambda i, j: (i, 0)),
            scratch_shapes=[pltpu.VMEM((tm_eff, ne_p), jnp.float32)],
        ),
        compiler_params=pltpu.CompilerParams(
            dimension_semantics=("parallel", "arbitrary"),
            vmem_limit_bytes=vmem_limit),
        cost_estimate=cost,
    )(*inputs)

    return out[:M, :n_embed].reshape(orig_shape)


# ---------------------------------------------------------------------------
# Reference / demo
# ---------------------------------------------------------------------------
def _init_params(key, n_embed, dtype=jnp.float32):
    """Deterministic init mimicking torch.nn.Linear (uniform +/- 1/sqrt(fan_in))."""
    hidden = 4 * n_embed
    k1, k2, k3, k4 = jax.random.split(key, 4)
    bound1 = 1.0 / (n_embed ** 0.5)
    bound2 = 1.0 / (hidden ** 0.5)
    # stored transposed vs. PyTorch (in, out) so the kernel does x @ w
    w1 = jax.random.uniform(k1, (n_embed, hidden), dtype, -bound1, bound1)
    b1 = jax.random.uniform(k2, (hidden,), dtype, -bound1, bound1)
    w2 = jax.random.uniform(k3, (hidden, n_embed), dtype, -bound2, bound2)
    b2 = jax.random.uniform(k4, (n_embed,), dtype, -bound2, bound2)
    return w1, b1, w2, b2


def _reference(x, w1, b1, w2, b2):
    hi = jax.lax.Precision.HIGHEST      # full-f32 reference on TPU
    h = jnp.maximum(jnp.dot(x, w1, precision=hi) + b1, 0.0)
    return jnp.dot(h, w2, precision=hi) + b2  # dropout is identity in eval mode


if __name__ == "__main__":
    key = jax.random.PRNGKey(0)
    kx, kp = jax.random.split(key)

    B, T, n_embed = 2, 8, 32          # small GPT-ish shapes; hidden = 128
    x = jax.random.normal(kx, (B, T, n_embed), dtype=jnp.float32)
    w1, b1, w2, b2 = _init_params(kp, n_embed)

    # Eval-mode forward (dropout = identity), matching module.eval() semantics.
    y = feed_forward(x, w1, b1, w2, b2, training=False)
    y = jax.block_until_ready(y)
    y_ref = _reference(x.reshape(-1, n_embed), w1, b1, w2, b2).reshape(x.shape)
    assert jnp.allclose(y, y_ref, atol=1e-4, rtol=1e-4), "eval mismatch vs reference"

    # Training-mode forward (inverted dropout, jax.random keep-mask).
    y_tr = jax.block_until_ready(
        feed_forward(x, w1, b1, w2, b2, training=True, seed=123))
    assert y_tr.shape == x.shape
    drop_frac = float(jnp.mean(y_tr == 0.0))
    assert 0.02 < drop_frac < 0.5, f"unexpected dropout fraction {drop_frac}"
    kept = y_tr != 0.0
    assert jnp.allclose(jnp.where(kept, y_tr, 0.0),
                        jnp.where(kept, y_ref / (1.0 - DROPOUT), 0.0),
                        atol=1e-4, rtol=1e-4), "kept values must be scaled reference"

    print("KERNEL_OK")
</pallas_src>

<mosaic_0001>
module attributes {stable_mosaic.version = 11 : i64} {
  func.func @_ffn_kernel(%arg0: i32, %arg1: i32, %arg2: memref<16x128xf32, #tpu.memory_space<vmem>>, %arg3: memref<128x128xf32, #tpu.memory_space<vmem>>, %arg4: memref<1x128xf32, #tpu.memory_space<vmem>>, %arg5: memref<128x128xf32, #tpu.memory_space<vmem>>, %arg6: memref<1x128xf32, #tpu.memory_space<vmem>>, %arg7: memref<16x128xf32, #tpu.memory_space<vmem>>, %arg8: memref<16x128xf32, #tpu.memory_space<vmem>>) attributes {dimension_semantics = [#tpu.dimension_semantics<parallel>, #tpu.dimension_semantics<arbitrary>], iteration_bounds = array<i64: 1, 1>, scalar_prefetch = 0 : i64, scratch_operands = 1 : i64, tpu.core_type = #tpu.core_type<tc>, window_params = [{transform_indices = @transform_0, window_bounds = array<i64: 16, 128>}, {transform_indices = @transform_1, window_bounds = array<i64: 128, 128>}, {transform_indices = @transform_2, window_bounds = array<i64: 1, 128>}, {transform_indices = @transform_3, window_bounds = array<i64: 128, 128>}, {pipeline_mode = #tpu.pipeline_mode<synchronous>, transform_indices = @transform_4, window_bounds = array<i64: 1, 128>}, {transform_indices = @transform_5, window_bounds = array<i64: 16, 128>}]} {
    %c0_i32 = arith.constant 0 : i32
    %0 = arith.cmpi eq, %arg1, %c0_i32 : i32
    %1 = arith.extui %0 : i1 to i32
    %c0_i32_0 = arith.constant 0 : i32
    %2 = arith.cmpi ne, %1, %c0_i32_0 : i32
    scf.if %2 {
      %c0_16 = arith.constant 0 : index
      %c0_17 = arith.constant 0 : index
      %19 = vector.load %arg6[%c0_16, %c0_17] : memref<1x128xf32, #tpu.memory_space<vmem>>, vector<1x128xf32>
      %20 = vector.shape_cast %19 : vector<1x128xf32> to vector<1x128xf32>
      %21 = vector.broadcast %20 : vector<1x128xf32> to vector<16x128xf32>
      %c0_18 = arith.constant 0 : index
      %c0_19 = arith.constant 0 : index
      %22 = vector.load %arg8[%c0_18, %c0_19] : memref<16x128xf32, #tpu.memory_space<vmem>>, vector<16x128xf32>
      tpu.vector_store %arg8[%c0_18, %c0_19], %21 {strides = array<i32>} : memref<16x128xf32, #tpu.memory_space<vmem>>, vector<16x128xf32>,
    } else {
    }
    %c0 = arith.constant 0 : index
    %c0_1 = arith.constant 0 : index
    %3 = vector.load %arg2[%c0, %c0_1] : memref<16x128xf32, #tpu.memory_space<vmem>>, vector<16x128xf32>
    %c0_2 = arith.constant 0 : index
    %c0_3 = arith.constant 0 : index
    %4 = vector.load %arg3[%c0_2, %c0_3] : memref<128x128xf32, #tpu.memory_space<vmem>>, vector<128x128xf32>
    %cst = arith.constant dense<0.000000e+00> : vector<16x128xf32>
    %5 = tpu.matmul %3, %4, %cst {dimension_numbers = #tpu.dot_dimension_numbers<[1], [0], [0], [1], [0, 0, 1, 1], [], []>} : vector<16x128xf32>, vector<128x128xf32>, vector<16x128xf32> -> vector<16x128xf32>
    %c0_4 = arith.constant 0 : index
    %c0_5 = arith.constant 0 : index
    %6 = vector.load %arg4[%c0_4, %c0_5] : memref<1x128xf32, #tpu.memory_space<vmem>>, vector<1x128xf32>
    %7 = vector.broadcast %6 : vector<1x128xf32> to vector<16x128xf32>
    %8 = arith.addf %5, %7 : vector<16x128xf32>
    %cst_6 = arith.constant 0.000000e+00 : f32
    %9 = vector.broadcast %cst_6 : f32 to vector<16x128xf32>
    %10 = arith.maximumf %8, %9 : vector<16x128xf32>
    %c0_7 = arith.constant 0 : index
    %c0_8 = arith.constant 0 : index
    %11 = vector.load %arg8[%c0_7, %c0_8] : memref<16x128xf32, #tpu.memory_space<vmem>>, vector<16x128xf32>
    %c0_9 = arith.constant 0 : index
    %c0_10 = arith.constant 0 : index
    %12 = vector.load %arg5[%c0_9, %c0_10] : memref<128x128xf32, #tpu.memory_space<vmem>>, vector<128x128xf32>
    %cst_11 = arith.constant dense<0.000000e+00> : vector<16x128xf32>
    %13 = tpu.matmul %10, %12, %cst_11 {dimension_numbers = #tpu.dot_dimension_numbers<[1], [0], [0], [1], [0, 0, 1, 1], [], []>} : vector<16x128xf32>, vector<128x128xf32>, vector<16x128xf32> -> vector<16x128xf32>
    %14 = arith.addf %11, %13 : vector<16x128xf32>
    %c0_12 = arith.constant 0 : index
    %c0_13 = arith.constant 0 : index
    %15 = vector.load %arg8[%c0_12, %c0_13] : memref<16x128xf32, #tpu.memory_space<vmem>>, vector<16x128xf32>
    tpu.vector_store %arg8[%c0_12, %c0_13], %14 {strides = array<i32>} : memref<16x128xf32, #tpu.memory_space<vmem>>, vector<16x128xf32>,
    %c0_i32_14 = arith.constant 0 : i32
    %16 = arith.cmpi eq, %arg1, %c0_i32_14 : i32
    %17 = arith.extui %16 : i1 to i32
    %c0_i32_15 = arith.constant 0 : i32
    %18 = arith.cmpi ne, %17, %c0_i32_15 : i32
    scf.if %18 {
      %c0_16 = arith.constant 0 : index
      %c0_17 = arith.constant 0 : index
      %19 = vector.load %arg8[%c0_16, %c0_17] : memref<16x128xf32, #tpu.memory_space<vmem>>, vector<16x128xf32>
      %c0_18 = arith.constant 0 : index
      %c0_19 = arith.constant 0 : index
      %20 = vector.load %arg7[%c0_18, %c0_19] : memref<16x128xf32, #tpu.memory_space<vmem>>, vector<16x128xf32>
      tpu.vector_store %arg7[%c0_18, %c0_19], %19 {strides = array<i32>} : memref<16x128xf32, #tpu.memory_space<vmem>>, vector<16x128xf32>,
    } else {
    }
    return
  }
  func.func @transform_0(%arg0: i32, %arg1: i32) -> (i32, i32) {
    %c0_i32 = arith.constant 0 : i32
    %c0_i32_0 = arith.constant 0 : i32
    return %arg0, %c0_i32 : i32, i32
  }
  func.func @transform_1(%arg0: i32, %arg1: i32) -> (i32, i32) {
    %c0_i32 = arith.constant 0 : i32
    %c0_i32_0 = arith.constant 0 : i32
    return %c0_i32, %arg1 : i32, i32
  }
  func.func @transform_2(%arg0: i32, %arg1: i32) -> (i32, i32) {
    %c0_i32 = arith.constant 0 : i32
    %c0_i32_0 = arith.constant 0 : i32
    return %c0_i32, %arg1 : i32, i32
  }
  func.func @transform_3(%arg0: i32, %arg1: i32) -> (i32, i32) {
    %c0_i32 = arith.constant 0 : i32
    %c0_i32_0 = arith.constant 0 : i32
    return %arg1, %c0_i32 : i32, i32
  }
  func.func @transform_4(%arg0: i32, %arg1: i32) -> (i32, i32) {
    %c0_i32 = arith.constant 0 : i32
    %c0_i32_0 = arith.constant 0 : i32
    %c0_i32_1 = arith.constant 0 : i32
    return %c0_i32, %c0_i32_0 : i32, i32
  }
  func.func @transform_5(%arg0: i32, %arg1: i32) -> (i32, i32) {
    %c0_i32 = arith.constant 0 : i32
    %c0_i32_0 = arith.constant 0 : i32
    return %arg0, %c0_i32 : i32, i32
  }
}

</mosaic_0001>

<bundles_post_ra>
// kernel: tpu_custom_call.1
= control target key start
LH: loop header
LB: loop body
LE: loop exit
PB: predicated region body
PF: predicated region fallthrough
CT: control target
= control target key end

     0   :  { %10 = vsyncpa [#allocation4], 0  ;;  %s565_s0 = inlined_call_operand.hbm [shape: f32[16,128], index: 0, kind: input, shape index: {}]   ;;  %s566_s1 = inlined_call_operand.hbm [shape: f32[128,128], index: 1, kind: input, shape index: {}]   ;;  %s567_s2 = inlined_call_operand.vmem [shape: f32[1,128], index: 2, kind: input, shape index: {}]   ;;  %s568_s3 = inlined_call_operand.hbm [shape: f32[128,128], index: 3, kind: input, shape index: {}]   ;;  %s569_s4 = inlined_call_operand.vmem [shape: f32[1,128], index: 4, kind: input, shape index: {}]   ;;  %s570_s5 = inlined_call_operand.hbm [shape: f32[16,128], index: 5, kind: output, shape index: {}]  }
   0x1   :  { %11 = vsyncpa [#allocation7], 0 }
   0x2   :  { %12 = vsyncpa [#allocation5], 0  ;;  %s499_s18 = smov [#allocation6]   ;;  %s500_s20 = smov [#allocation3]  }
   0x3   :  { %s30_s19 = sshll.u32 %s499_s18, 4  ;;  %s18_s21 = sshll.u32 %s500_s20, 4  ;;  %s31_s19 = int_to_ptr.vmem [resolvable:$true] %s30_s19  ;;  %s19_s21 = int_to_ptr.vmem [resolvable:$true] %s18_s21 }
   0x4   :  { %s421_s22 = scalar_lea.vmem %s31_s19, 2048  ;;  %p426_p1 = scmp.lt.s32.totalorder %s31_s19, %s31_s19 }
   0x5   :  { %p422_p0 = scmp.ne.s32.totalorder %s31_s19, %s421_s22  ;;  %p427_p2 = scmp.lt.s32.totalorder %s421_s22, %s421_s22 }
   0x7   :  { %p428_p3 = por %p427_p2, %p426_p1 }
   0x9   :  { %p429_p4 = pnand %p428_p3, %p422_p0 }
   0xb   :  { %432 = shalt.err (!%p429_p4)
}
   0xc   :  { %s501_s23 = smov 128   ;;  %s502_s24 = smov 8  }
   0xd   :  { %36 = dma.hbm_to_vmem [thread:$0]  %s566_s1, 2048, %s31_s19, [#allocation7], %s501_s23, %s501_s23, %s502_s24  }
   0xe   :  { %s441_s27 = scalar_lea.vmem %s19_s21, 256  ;;  %p446_p6 = scmp.lt.s32.totalorder %s19_s21, %s19_s21 }
   0xf   :  { %p442_p5 = scmp.ne.s32.totalorder %s19_s21, %s441_s27  ;;  %p447_p7 = scmp.lt.s32.totalorder %s441_s27, %s441_s27 }
  0x11   :  { %p448_p8 = por %p447_p7, %p446_p6 }
  0x13   :  { %p449_p9 = pnand %p448_p8, %p442_p5 }
  0x15   :  { %452 = shalt.err (!%p449_p9)
}
  0x16   :  { %24 = dma.hbm_to_vmem [thread:$0]  %s565_s0, 256, %s19_s21, [#allocation4], %s501_s23, %s501_s23, %s502_s24  }
  0x17   :  { %s503_s30 = smov [#allocation8]  }
  0x18   :  { %s44_s6 = sshll.u32 %s503_s30, 4  ;;  %s45_s6 = int_to_ptr.vmem [resolvable:$true] %s44_s6 }
  0x19   :  { %s461_s7 = scalar_lea.vmem %s45_s6, 2048  ;;  %p466_p11 = scmp.lt.s32.totalorder %s45_s6, %s45_s6 }
  0x1a   :  { %p462_p10 = scmp.ne.s32.totalorder %s45_s6, %s461_s7  ;;  %p467_p12 = scmp.lt.s32.totalorder %s461_s7, %s461_s7 }
  0x1c   :  { %p468_p13 = por %p467_p12, %p466_p11 }
  0x1e   :  { %p469_p0 = pnand %p468_p13, %p462_p10 }
  0x20   :  { %472 = shalt.err (!%p469_p0)
}
  0x21   :  { %50 = dma.hbm_to_vmem [thread:$0]  %s568_s3, 2048, %s45_s6, [#allocation7], %s501_s23, %s501_s23, %s502_s24  }
  0x22   :  { %493 = dma.done.wait [#allocation4], 256  }
  0x23   :  { %494 = vsyncadd [#allocation4], 4294967040 }
  0x24   :  { %495 = dma.done.wait [#allocation7], 4096  }
  0x25   :  { %496 = vsyncadd [#allocation7], 4294963200  ;;  %v92_v0 = vld [vmem:[#allocation6 + $0x78] sm:$0xff]  ;;  %v91_v1 = vld [vmem:[#allocation6 + $0x70] sm:$0xff]  ;;  %s504_s11 = smov [#allocation9]  }
  0x26   :  { %337 = vmatprep.subr.mxu0 %v92_v0  ;;  %v90_v2 = vld [vmem:[#allocation6 + $0x68] sm:$0xff]  ;;  %v89_v3 = vld [vmem:[#allocation6 + $0x60] sm:$0xff]  ;;  %v75_v4 = vld [vmem:[#allocation3] sm:$0xff]  ;;  %s286_s12 = sshll.u32 %s504_s11, 4  ;;  %s287_s12 = int_to_ptr.vmem [resolvable:$true] %s286_s12 }
  0x27   :  { %338 = vmatpush3.msra.mxu0 %v92_v0  ;;  %v88_v5 = vld [vmem:[#allocation6 + $0x58] sm:$0xff]  ;;  %369 = vmatprep.mubr.f32.mxu0 %v75_v4  ;;  %v193_v7 = vld [vmem:[#allocation8 + $0x70] sm:$0xff]  ;;  %v192_v9 = vld [vmem:[#allocation8 + $0x68] sm:$0xff]  ;;  %p478_p2 = scmp.lt.s32.totalorder %s287_s12, %s287_s12 }
  0x28   :  { %339 = vmatprep.subr.mxu0 %v91_v1  ;;  %v194_v6 = vld [vmem:[#allocation8 + $0x78] sm:$0xff]  ;;  %v87_v8 = vld [vmem:[#allocation6 + $0x50] sm:$0xff]  ;;  %v86_v10 = vld [vmem:[#allocation6 + $0x48] sm:$0xff] }
  0x29   :  { %340 = vmatpush3.msra.mxu0 %v91_v1  ;;  %372 = vmatprep.subr.mxu1 %v194_v6  ;;  %v191_v11 = vld [vmem:[#allocation8 + $0x60] sm:$0xff]  ;;  %v190_v13 = vld [vmem:[#allocation8 + $0x58] sm:$0xff]  ;;  %v189_v15 = vld [vmem:[#allocation8 + $0x50] sm:$0xff] }
  0x2a   :  { %341 = vmatprep.subr.mxu0 %v90_v2  ;;  %373 = vmatpush3.msra.mxu1 %v194_v6  ;;  %v85_v12 = vld [vmem:[#allocation6 + $0x40] sm:$0xff]  ;;  %v84_v14 = vld [vmem:[#allocation6 + $0x38] sm:$0xff]  ;;  %v83_v16 = vld [vmem:[#allocation6 + $0x30] sm:$0xff] }
  0x2b   :  { %342 = vmatpush3.msra.mxu0 %v90_v2  ;;  %374 = vmatprep.subr.mxu1 %v193_v7  ;;  %v188_v17 = vld [vmem:[#allocation8 + $0x48] sm:$0xff]  ;;  %v187_v19 = vld [vmem:[#allocation8 + $0x40] sm:$0xff]  ;;  %v186_v21 = vld [vmem:[#allocation8 + $0x38] sm:$0xff] }
  0x2c   :  { %343 = vmatprep.subr.mxu0 %v89_v3  ;;  %375 = vmatpush3.msra.mxu1 %v193_v7  ;;  %v82_v18 = vld [vmem:[#allocation6 + $0x28] sm:$0xff]  ;;  %v81_v20 = vld [vmem:[#allocation6 + $0x20] sm:$0xff]  ;;  %v80_v22 = vld [vmem:[#allocation6 + $0x18] sm:$0xff] }
  0x2d   :  { %344 = vmatpush3.msra.mxu0 %v89_v3  ;;  %376 = vmatprep.subr.mxu1 %v192_v9  ;;  %v185_v23 = vld [vmem:[#allocation8 + $0x30] sm:$0xff]  ;;  %v184_v25 = vld [vmem:[#allocation8 + $0x28] sm:$0xff]  ;;  %v183_v27 = vld [vmem:[#allocation8 + $0x20] sm:$0xff] }
  0x2e   :  { %345 = vmatprep.subr.mxu0 %v88_v5  ;;  %377 = vmatpush3.msra.mxu1 %v192_v9  ;;  %v79_v24 = vld [vmem:[#allocation6 + $0x10] sm:$0xff]  ;;  %v78_v26 = vld [vmem:[#allocation6 + $0x8] sm:$0xff]  ;;  %v77_v28 = vld [vmem:[#allocation6] sm:$0xff] }
  0x2f   :  { %346 = vmatpush3.msra.mxu0 %v88_v5  ;;  %378 = vmatprep.subr.mxu1 %v191_v11  ;;  %v76_v29 = vld [vmem:[#allocation3 + $0x8] sm:$0xff]  ;;  %v181_v31 = vld [vmem:[#allocation8 + $0x10] sm:$0xff]  ;;  %v180_v32 = vld [vmem:[#allocation8 + $0x8] sm:$0xff] }
  0x30   :  { %347 = vmatprep.subr.mxu0 %v87_v8  ;;  %379 = vmatpush3.msra.mxu1 %v191_v11  ;;  %v182_v30 = vld [vmem:[#allocation8 + $0x18] sm:$0xff]  ;;  %v179_v33 = vld [vmem:[#allocation8] sm:$0xff]  ;;  %v300_v34 = vld [vmem:[%s567_s2] ss:$0 sm:$0xff]  ;;  %s473_s2 = scalar_lea.vmem %s287_s12, 256 }
  0x31   :  { %348 = vmatpush3.msra.mxu0 %v87_v8  ;;  %380 = vmatprep.subr.mxu1 %v190_v13  ;;  %v299_v41 = vld [vmem:[%s569_s4] ss:$0 sm:$0xff]  ;;  %p474_p1 = scmp.ne.s32.totalorder %s287_s12, %s473_s2  ;;  %p479_p3 = scmp.lt.s32.totalorder %s473_s2, %s473_s2 }
  0x32   :  { %349 = vmatprep.subr.mxu0 %v86_v10  ;;  %381 = vmatpush3.msra.mxu1 %v190_v13 }
  0x33   :  { %350 = vmatpush3.msra.mxu0 %v86_v10  ;;  %382 = vmatprep.subr.mxu1 %v189_v15  ;;  %p480_p4 = por %p479_p3, %p478_p2 }
  0x34   :  { %351 = vmatprep.subr.mxu0 %v85_v12  ;;  %383 = vmatpush3.msra.mxu1 %v189_v15 }
  0x35   :  { %352 = vmatpush3.msra.mxu0 %v85_v12  ;;  %384 = vmatprep.subr.mxu1 %v188_v17  ;;  %p481_p5 = pnand %p480_p4, %p474_p1 }
  0x36   :  { %353 = vmatprep.subr.mxu0 %v84_v14  ;;  %385 = vmatpush3.msra.mxu1 %v188_v17 }
  0x37   :  { %354 = vmatpush3.msra.mxu0 %v84_v14  ;;  %386 = vmatprep.subr.mxu1 %v187_v19 }
  0x38   :  { %355 = vmatprep.subr.mxu0 %v83_v16  ;;  %387 = vmatpush3.msra.mxu1 %v187_v19 }
  0x39   :  { %356 = vmatpush3.msra.mxu0 %v83_v16  ;;  %388 = vmatprep.subr.mxu1 %v186_v21 }
  0x3a   :  { %357 = vmatprep.subr.mxu0 %v82_v18  ;;  %389 = vmatpush3.msra.mxu1 %v186_v21 }
  0x3b   :  { %358 = vmatpush3.msra.mxu0 %v82_v18  ;;  %390 = vmatprep.subr.mxu1 %v185_v23 }
  0x3c   :  { %359 = vmatprep.subr.mxu0 %v81_v20  ;;  %391 = vmatpush3.msra.mxu1 %v185_v23 }
  0x3d   :  { %360 = vmatpush3.msra.mxu0 %v81_v20  ;;  %392 = vmatprep.subr.mxu1 %v184_v25 }
  0x3e   :  { %361 = vmatprep.subr.mxu0 %v80_v22  ;;  %393 = vmatpush3.msra.mxu1 %v184_v25 }
  0x3f   :  { %362 = vmatpush3.msra.mxu0 %v80_v22  ;;  %394 = vmatprep.subr.mxu1 %v183_v27 }
  0x40   :  { %363 = vmatprep.subr.mxu0 %v79_v24  ;;  %395 = vmatpush3.msra.mxu1 %v183_v27 }
  0x41   :  { %364 = vmatpush3.msra.mxu0 %v79_v24  ;;  %396 = vmatprep.subr.mxu1 %v182_v30 }
  0x42   :  { %365 = vmatprep.subr.mxu0 %v78_v26  ;;  %397 = vmatpush3.msra.mxu1 %v182_v30 }
  0x43   :  { %366 = vmatpush3.msra.mxu0 %v78_v26  ;;  %398 = vmatprep.subr.mxu1 %v181_v31 }
  0x44   :  { %367 = vmatprep.subr.mxu0 %v77_v28  ;;  %399 = vmatpush3.msra.mxu1 %v181_v31 }
  0x45   :  { %368 = vmatpush3.msra.mxu0 %v77_v28  ;;  %400 = vmatprep.subr.mxu1 %v180_v32 }
  0x46   :  { %370 = vmatmul.mubr.f32.vlgmr.msra.gmra.mxu0 %v76_v29  ;;  %401 = vmatpush3.msra.mxu1 %v180_v32 }
  0x47   :  { %402 = vmatprep.subr.mxu1 %v179_v33 }
  0x48   :  { %403 = vmatpush3.msra.mxu1 %v179_v33 }
 0x106   :  { %v371_v35 = vpop.f32.mrf.mxu0 }
 0x107   :  { %v172_v36 = vadd.f32 %v371_v35, %v300_v34 }
 0x108   :  { %v166_v37 = vpop.f32.mrf.mxu0 }
 0x109   :  { %v167_v38 = vadd.f32 %v300_v34, %v166_v37  ;;  %v176_v40 = vmax.f32 %v172_v36, 0.0 }
 0x10b   :  { %v175_v39 = vmax.f32 %v167_v38, 0.0 }
 0x10d   :  { %404 = vmatprep.mubr.f32.mxu1 %v175_v39 }
 0x10e   :  { %405 = vmatmul.mubr.f32.vlgmr.msra.gmra.mxu1 %v176_v40 }
 0x1ce   :  { %v406_v42 = vpop.f32.mrf.mxu1 }
 0x1cf   :  { %v271_v43 = vadd.f32 %v406_v42, %v299_v41 }
 0x1d0   :  { %v261_v44 = vpop.f32.mrf.mxu1 }
 0x1d1   :  { %280 = vst [vmem:[#allocation9 + $0x8] sm:$0xff] %v271_v43  ;;  %v270_v45 = vadd.f32 %v299_v41, %v261_v44 }
 0x1d3   :  { %279 = vst [vmem:[#allocation9] sm:$0xff] %v270_v45 }
 0x1d4   :  { %484 = shalt.err (!%p481_p5)
}
 0x1d5   :  { %292 = dma.vmem_to_hbm [thread:$0]  %s287_s12, 256, %s570_s5, [#allocation5], %s501_s23, %s501_s23, %s502_s24  }
 0x1d6   :  { %497 = dma.done.wait [#allocation5], 256  }
 0x1d7   :  { %498 = vsyncadd [#allocation5], 4294967040 }
 0x1d8   :  { %296 = vsyncpa [#allocation4], 1 }
 0x1d9   :  { %297 = vsyncpa [#allocation7], 1 }
 0x1da   :  { %298 = vsyncpa [#allocation5], 1 }

</bundles_post_ra>
